<compile_context>
chip_gen: v5e
topology: v5e:2x2
jax: 0.10.0
libtpu: 0.0.40
codegen_flags: <defaults>
</compile_context>

<pallas_src>
import math

import jax
import jax.numpy as jnp
from jax.experimental import pallas as pl
from jax.experimental.pallas import tpu as pltpu


# --------------------------------------------------------------------------- #
# Tiling helpers
# --------------------------------------------------------------------------- #

def _round_up(x, m):
    return ((x + m - 1) // m) * m


def _plan_tiles(batch, node_num=1, vmem_budget=8 * 1024 * 1024):
    """Pick (tile_b, num_tiles, padded_batch) for a lane-major batch axis.

    tile_b is a multiple of 128 (lane width), sized so the per-step
    (node_num, tile_b) f32 input block stays inside `vmem_budget` including
    double buffering, with >= 2 grid steps when the batch allows (v7x megacore)
    and minimal tail padding.
    """
    lane = 128
    b128 = _round_up(batch, lane)
    # cap from the VMEM budget (double-buffered f32 input block), lane-aligned
    cap = max(lane, (vmem_budget // (2 * 4 * max(node_num, 1))) // lane * lane)
    cap = min(cap, 4096)
    if b128 <= lane:
        tb = lane
    else:
        nt_target = max(2, pl.cdiv(b128, cap))           # >= 2 steps for megacore
        tb = min(cap, _round_up(pl.cdiv(batch, nt_target), lane))
        tb = max(lane, tb)
    nt = pl.cdiv(batch, tb)
    return tb, nt, nt * tb


def _sample_lane_noise(key, b_pad):
    """(1, b_pad) i.i.d. standard normals, lane-dense (one per batch row)."""
    return jax.random.normal(key, (1, b_pad), jnp.float32)


def _sample_node_noise(key, node_num, b_pad):
    """(node_num, b_pad) standard normals; column j = pre_forward noise of row j."""
    return jax.random.normal(key, (node_num, b_pad), jnp.float32)


# --------------------------------------------------------------------------- #
# Fast path: reparameterized head.  w @ z + b, z ~ N(0, I_N)  ==  ||w||*eps + b
# --------------------------------------------------------------------------- #

def _reparam_head_kernel(params_ref, z_ref, o_ref):
    """o[0, :] = sigmoid(scale * z[0, :] + bias) for the current batch tile.

    params_ref: (1, 128) f32 VMEM (resident): [0,0]=||w||_2, [0,1]=bias
    z_ref:      (1, TB)  f32 VMEM, lane-dense standard normals
    o_ref:      (1, TB)  f32 VMEM, lane-dense outputs
    """
    scale = params_ref[0, 0]
    bias = params_ref[0, 1]
    logits = scale * z_ref[...] + bias
    o_ref[...] = 1.0 / (1.0 + jnp.exp(-logits))          # exact sigmoid


def fused_forward(key, weight, bias, batch):
    """sigmoid(Linear(node_num, 1)(randn(batch, node_num))) via reparameterization.

    weight: (1, node_num) f32, bias: (1,) f32; returns (batch, 1) f32.
    Distribution-identical to the reference forward without ever materializing
    the (batch, node_num) noise tensor.
    """
    tb, nt, b_pad = _plan_tiles(batch, node_num=1)
    scale = jnp.sqrt(jnp.sum(weight.astype(jnp.float32) ** 2))
    params = (jnp.zeros((1, 128), jnp.float32)
              .at[0, 0].set(scale)
              .at[0, 1].set(bias[0]))
    z = _sample_lane_noise(key, b_pad)
    out = pl.pallas_call(
        _reparam_head_kernel,
        out_shape=jax.ShapeDtypeStruct((1, b_pad), jnp.float32),
        grid=(nt,),
        in_specs=[
            pl.BlockSpec((1, 128), lambda i: (0, 0)),     # params, VMEM-resident
            pl.BlockSpec((1, tb), lambda i: (0, i)),      # noise tile, lane-dense
        ],
        out_specs=pl.BlockSpec((1, tb), lambda i: (0, i)),
        compiler_params=pltpu.CompilerParams(
            dimension_semantics=("parallel",)),
    )(params, z)
    return out[0, :batch].reshape(batch, 1)


# --------------------------------------------------------------------------- #
# Explicit path: materialized pre_forward noise + full Linear + sigmoid
# --------------------------------------------------------------------------- #

def _linear_sigmoid_kernel(w_ref, params_ref, h_ref, o_ref):
    """o[0, :] = sigmoid(w . h[:, :] + b) per batch column of the tile.

    w_ref:      (N, 1)   f32 VMEM (resident)
    params_ref: (1, 128) f32 VMEM (resident): [0,0]=bias
    h_ref:      (N, TB)  f32 VMEM, node-major noise tile
    o_ref:      (1, TB)  f32 VMEM, lane-dense outputs
    """
    # VPU broadcast-multiply + XLU sublane reduce; an M=1 MXU dot would waste
    # 127/128 (or 255/256) of the MXU rows, so keep the contraction off it.
    logits = jnp.sum(h_ref[...] * w_ref[...], axis=0, keepdims=True) + params_ref[0, 0]
    o_ref[...] = 1.0 / (1.0 + jnp.exp(-logits))          # exact sigmoid


def explicit_forward(key, weight, bias, batch):
    """Same head, but with the (node_num, batch) noise actually materialized.

    Returns (out (batch, 1), h (node_num, b_pad)) so callers can verify exactly.
    """
    node_num = weight.shape[1]
    # TODO(synk): for very large node_num, chunk the node axis inside the kernel
    # (lax.fori_loop accumulator) instead of letting tile_b collapse toward 128.
    tb, nt, b_pad = _plan_tiles(batch, node_num=node_num)
    h = _sample_node_noise(key, node_num, b_pad)          # pre_forward noise
    w_col = weight.reshape(node_num, 1).astype(jnp.float32)
    params = jnp.zeros((1, 128), jnp.float32).at[0, 0].set(bias[0])
    out = pl.pallas_call(
        _linear_sigmoid_kernel,
        out_shape=jax.ShapeDtypeStruct((1, b_pad), jnp.float32),
        grid=(nt,),
        in_specs=[
            pl.BlockSpec((node_num, 1), lambda i: (0, 0)),    # weight, resident
            pl.BlockSpec((1, 128), lambda i: (0, 0)),         # bias, resident
            pl.BlockSpec((node_num, tb), lambda i: (0, i)),   # noise tile
        ],
        out_specs=pl.BlockSpec((1, tb), lambda i: (0, i)),
        compiler_params=pltpu.CompilerParams(
            dimension_semantics=("parallel",)),
        cost_estimate=pl.CostEstimate(
            flops=2 * node_num * b_pad,
            transcendentals=b_pad,
            bytes_accessed=4 * (node_num * b_pad + node_num + 128 + b_pad)),
    )(w_col, params, h)
    return out[0, :batch].reshape(batch, 1), h


# --------------------------------------------------------------------------- #
# Model wrapper
# --------------------------------------------------------------------------- #

class BaseModelJAX:
    """JAX/Pallas port of BaseModel with a label task (`nodes_to_label` head)."""

    def __init__(self, node_num, out_num, key):
        self.node_num = node_num
        self.out_num = out_num
        # torch.nn.Linear(node_num, 1) init: U(-1/sqrt(in), +1/sqrt(in)).
        kw, kb = jax.random.split(key)
        bound = 1.0 / math.sqrt(node_num)
        self.weight = jax.random.uniform(
            kw, (1, node_num), jnp.float32, -bound, bound)
        self.bias = jax.random.uniform(
            kb, (1,), jnp.float32, -bound, bound)

    def forward(self, data, key, exact_noise=False):
        if data.ndim != 3:
            # TODO(synk): the 1-D pre_forward branch (data.dim() != 3) is dead code
            # in the reference forward (its shape[-2] assert cannot hold); not ported.
            raise NotImplementedError("only 3-D (batched) data is supported")
        batch = data.shape[0]
        if exact_noise:
            out, _ = explicit_forward(key, self.weight, self.bias, batch)
            return out
        # Fast path: identical output distribution, ~node_num x less PRNG work.
        return fused_forward(key, self.weight, self.bias, batch)


# --------------------------------------------------------------------------- #
# Demo / self-check
# --------------------------------------------------------------------------- #

if __name__ == "__main__":
    root = jax.random.PRNGKey(0)
    k_param, k_data, k_fast, k_exact = jax.random.split(root, 4)

    B, NODE_NUM, FEAT = 8, 128, 4
    model = BaseModelJAX(node_num=NODE_NUM, out_num=1, key=k_param)
    data = jax.random.normal(k_data, (B, NODE_NUM, FEAT), jnp.float32)

    # ---- fast (reparameterized) forward ------------------------------------
    out_fast = jax.block_until_ready(model.forward(data, k_fast))
    assert out_fast.shape == (B, 1), out_fast.shape
    assert bool(jnp.all(jnp.isfinite(out_fast)))
    assert bool(jnp.all((out_fast >= 0.0) & (out_fast <= 1.0)))

    # exact per-element reference (same eps draw, plain JAX)
    _, _, b_pad = _plan_tiles(B, node_num=1)
    eps = _sample_lane_noise(k_fast, b_pad)[0, :B]
    scale = jnp.sqrt(jnp.sum(model.weight ** 2))
    ref_fast = 1.0 / (1.0 + jnp.exp(-(scale * eps + model.bias[0])))
    assert jnp.allclose(out_fast[:, 0], ref_fast, atol=1e-5, rtol=1e-5), \
        (out_fast[:, 0], ref_fast)

    # ---- explicit forward (materialized noise + full Linear in-kernel) -----
    out_exact, h = explicit_forward(k_exact, model.weight, model.bias, B)
    out_exact = jax.block_until_ready(out_exact)
    assert out_exact.shape == (B, 1), out_exact.shape
    ref_exact = 1.0 / (1.0 + jnp.exp(-(model.weight @ h[:, :B] + model.bias[0])))
    assert jnp.allclose(out_exact[:, 0], ref_exact[0], atol=1e-4, rtol=1e-4), \
        (out_exact[:, 0], ref_exact[0])

    print("KERNEL_OK")
</pallas_src>

<mosaic_0001>
module attributes {stable_mosaic.version = 11 : i64} {
  func.func @_reparam_head_kernel(%arg0: i32, %arg1: memref<1x128xf32, #tpu.memory_space<vmem>>, %arg2: memref<1x128xf32, #tpu.memory_space<vmem>>, %arg3: memref<1x128xf32, #tpu.memory_space<vmem>>) attributes {dimension_semantics = [#tpu.dimension_semantics<parallel>], iteration_bounds = array<i64: 1>, scalar_prefetch = 0 : i64, scratch_operands = 0 : i64, tpu.core_type = #tpu.core_type<tc>, window_params = [{pipeline_mode = #tpu.pipeline_mode<synchronous>, transform_indices = @transform_0, window_bounds = array<i64: 1, 128>}, {transform_indices = @transform_1, window_bounds = array<i64: 1, 128>}, {transform_indices = @transform_2, window_bounds = array<i64: 1, 128>}]} {
    %c0 = arith.constant 0 : index
    %c0_0 = arith.constant 0 : index
    %0 = vector.load %arg1[%c0, %c0_0] : memref<1x128xf32, #tpu.memory_space<vmem>>, vector<1x1xf32>
    %1 = vector.extract %0[0, 0] : f32 from vector<1x1xf32>
    %c0_1 = arith.constant 0 : index
    %c1 = arith.constant 1 : index
    %2 = vector.load %arg1[%c0_1, %c1] : memref<1x128xf32, #tpu.memory_space<vmem>>, vector<1x1xf32>
    %3 = vector.extract %2[0, 0] : f32 from vector<1x1xf32>
    %c0_2 = arith.constant 0 : index
    %c0_3 = arith.constant 0 : index
    %4 = vector.load %arg2[%c0_2, %c0_3] : memref<1x128xf32, #tpu.memory_space<vmem>>, vector<1x128xf32>
    %5 = vector.broadcast %1 : f32 to vector<1x128xf32>
    %6 = arith.mulf %5, %4 : vector<1x128xf32>
    %7 = vector.broadcast %3 : f32 to vector<1x128xf32>
    %8 = arith.addf %6, %7 : vector<1x128xf32>
    %cst = arith.constant 0.000000e+00 : f32
    %9 = vector.broadcast %cst : f32 to vector<1x128xf32>
    %10 = arith.subf %9, %8 : vector<1x128xf32>
    %11 = math.exp %10 : vector<1x128xf32>
    %cst_4 = arith.constant 1.000000e+00 : f32
    %12 = vector.broadcast %cst_4 : f32 to vector<1x128xf32>
    %13 = arith.addf %12, %11 : vector<1x128xf32>
    %cst_5 = arith.constant 1.000000e+00 : f32
    %14 = vector.broadcast %cst_5 : f32 to vector<1x128xf32>
    %15 = arith.divf %14, %13 : vector<1x128xf32>
    %c0_6 = arith.constant 0 : index
    %c0_7 = arith.constant 0 : index
    %16 = vector.load %arg3[%c0_6, %c0_7] : memref<1x128xf32, #tpu.memory_space<vmem>>, vector<1x128xf32>
    tpu.vector_store %arg3[%c0_6, %c0_7], %15 {strides = array<i32>} : memref<1x128xf32, #tpu.memory_space<vmem>>, vector<1x128xf32>,
    return
  }
  func.func @transform_0(%arg0: i32) -> (i32, i32) {
    %c0_i32 = arith.constant 0 : i32
    %c0_i32_0 = arith.constant 0 : i32
    %c0_i32_1 = arith.constant 0 : i32
    return %c0_i32, %c0_i32_0 : i32, i32
  }
  func.func @transform_1(%arg0: i32) -> (i32, i32) {
    %c0_i32 = arith.constant 0 : i32
    %c0_i32_0 = arith.constant 0 : i32
    return %c0_i32, %arg0 : i32, i32
  }
  func.func @transform_2(%arg0: i32) -> (i32, i32) {
    %c0_i32 = arith.constant 0 : i32
    %c0_i32_0 = arith.constant 0 : i32
    return %c0_i32, %arg0 : i32, i32
  }
}

</mosaic_0001>

<bundles_post_ra>
// kernel: tpu_custom_call.1
= control target key start
LH: loop header
LB: loop body
LE: loop exit
PB: predicated region body
PF: predicated region fallthrough
CT: control target
= control target key end

     0   :  { %7 = vsyncpa [#allocation3], 0  ;;  %s208_s0 = inlined_call_operand.hbm [shape: f32[1,128], index: 0, kind: input, shape index: {}]   ;;  %s209_s1 = inlined_call_operand.hbm [shape: f32[1,128], index: 1, kind: input, shape index: {}]   ;;  %s210_s2 = inlined_call_operand.hbm [shape: f32[1,128], index: 2, kind: output, shape index: {}]  }
   0x1   :  { %8 = vsyncpa [#allocation6], 0 }
   0x2   :  { %9 = vsyncpa [#allocation4], 0  ;;  %s15_s11 = sshll.u32 %s208_s0, 4  ;;  %s180_s12 = smov [#allocation2]   ;;  %s16_s11 = int_to_ptr.hbm [resolvable:$true] %s15_s11 }
   0x3   :  { %s17_s13 = sshll.u32 %s180_s12, 4  ;;  %s26_s16 = sshll.u32 %s209_s1, 4  ;;  %s18_s13 = int_to_ptr.vmem [resolvable:$true] %s17_s13  ;;  %s27_s16 = int_to_ptr.hbm [resolvable:$true] %s26_s16 }
   0x4   :  { %20 = dma.hbm_to_vmem [thread:$0]  %s16_s11, 16, %s18_s13, [#allocation3]  }
   0x5   :  { %s181_s17 = smov [#allocation5]  }
   0x6   :  { %s28_s18 = sshll.u32 %s181_s17, 4  ;;  %s29_s18 = int_to_ptr.vmem [resolvable:$true] %s28_s18 }
   0x7   :  { %31 = dma.hbm_to_vmem [thread:$0]  %s27_s16, 16, %s29_s18, [#allocation6]  }
   0x8   :  { %174 = dma.done.wait [#allocation3], 16  }
   0x9   :  { %175 = vsyncadd [#allocation3], 4294967280 }
   0xa   :  { %176 = dma.done.wait [#allocation6], 16  }
   0xb   :  { %177 = vsyncadd [#allocation6], 4294967280  ;;  %v40_v0 = vld [vmem:[#allocation2] sm:$0x1]  ;;  %s182_s0 = smov 127   ;;  %s183_s20 = smov [#allocation7]  }
   0xc   :  { %43 = vrot.lane.b32.xlu0 %v40_v0, %s182_s0  ;;  %90 = vpush %v40_v0  ;;  %v47_v2 = vld [vmem:[#allocation5] sm:$0x1]  ;;  %s77_s21 = sshll.u32 %s183_s20, 4  ;;  %s79_s24 = sshll.u32 %s210_s2, 4  ;;  %s78_s21 = int_to_ptr.vmem [resolvable:$true] %s77_s21  ;;  %s80_s24 = int_to_ptr.hbm [resolvable:$true] %s79_s24 }
  0x3d   :  { %s91_s19 = spop %90 }
  0x3e   :  { %v48_v3 = vstv %s91_s19 }
  0x3f   :  { %v49_v4 = vmul.f32 %v48_v3, %v47_v2 }
  0x7e   :  { %v44_v1 = vpop.permute.xlu0 %43 }
  0x7f   :  { %92 = vpush %v44_v1 }
  0xb0   :  { %s93_s1 = spop %92 }
  0xb1   :  { %v50_v5 = vstv %s93_s1 }
  0xb2   :  { %v51_v6 = vadd.f32 %v50_v5, %v49_v4 }
  0xb4   :  { %v52_v7 = vsub.f32 0.0, %v51_v6 }
  0xb6   :  { %v53_v8 = vmul.f32 1.442695, %v52_v7 }
  0xb8   :  { %98 = vpow2.f32 %v53_v8 }
  0xbe   :  { %v99_v9 = vpop.eup %98 }
  0xbf   :  { %v55_v10 = vadd.f32 1.0, %v99_v9 }
  0xc1   :  { %100 = vrcp.f32 %v55_v10  ;;  %v67_v14 = vand.u32 2147483648, %v55_v10  ;;  %v65_v16 = vand.u32 2147483647, %v55_v10  ;;  %vm61_vm1 = vweird.f32 %v55_v10 }
  0xc3   :  { %v68_v18 = vor.u32 1.1754944e-38, %v67_v14  ;;  %vm66_vm3 = vcmp.eq.f32.partialorder %v65_v16, 8.507059e+37 }
  0xc7   :  { %v101_v11 = vpop.eup %100 }
  0xc8   :  { %v57_v12 = vmul.f32 %v101_v11, %v55_v10  ;;  %vm62_vm0 = vweird.f32 %v101_v11 }
  0xc9   :  { %vm63_vm2 = vmor %vm61_vm1, %vm62_vm0 }
  0xca   :  { %v58_v13 = vsub.f32 1.0, %v57_v12 }
  0xcc   :  { %v59_v15 = vmul.f32 %v101_v11, %v58_v13 }
  0xce   :  { %v60_v17 = vadd.f32 %v101_v11, %v59_v15 }
  0xd0   :  { %v64_v19 = vsel %vm63_vm2, %v101_v11, %v60_v17 }
  0xd1   :  { %v69_v20 = vsel %vm66_vm3, %v68_v18, %v64_v19 }
  0xd2   :  { %71 = vst [vmem:[#allocation7] sm:$0x1] %v69_v20 }
  0xd3   :  { %82 = dma.vmem_to_hbm [thread:$0]  %s78_s21, 16, %s80_s24, [#allocation4]  }
  0xd4   :  { %178 = dma.done.wait [#allocation4], 16  }
  0xd5   :  { %179 = vsyncadd [#allocation4], 4294967280 }
  0xd6   :  { %87 = vsyncpa [#allocation3], 1 }
  0xd7   :  { %88 = vsyncpa [#allocation6], 1 }
  0xd8   :  { %89 = vsyncpa [#allocation4], 1 }

</bundles_post_ra>
